<compile_context>
chip_gen: v5e
topology: v5e:2x2
jax: 0.10.0
libtpu: 0.0.40
codegen_flags: <defaults>
</compile_context>

<pallas_src>
import jax
import jax.numpy as jnp
from jax.experimental import pallas as pl
from jax.experimental.pallas import tpu as pltpu


# --------------------------------------------------------------------------- #
# Kernel
# --------------------------------------------------------------------------- #
def fused_splitter_kernel(x_ref, w_ref, b_ref, o_ref):
    """One (tm x tn) tile of  Y = X @ W_all + b_all  with K tiled on the grid.

    x_ref: (tm, tk)  bf16  shared-input tile (same rows for every n tile)
    w_ref: (tk, tn)  bf16  fused-weight tile (all sub-models concatenated on N)
    b_ref: (1,  tn)  f32   fused-bias tile (consumed only on the last K step)
    o_ref: (tm, tn)  f32   output tile; its block index ignores k, so it stays
                           VMEM-resident across the reduction and doubles as the
                           f32 accumulator (no scratch, no finalize copy).
    """
    k = pl.program_id(2)
    partial = jnp.dot(x_ref[...], w_ref[...], preferred_element_type=jnp.float32)

    @pl.when(k == 0)
    def _():
        o_ref[...] = partial            # direct first store: no zero-init + add

    @pl.when(k > 0)
    def _():
        o_ref[...] += partial

    @pl.when(k == pl.num_programs(2) - 1)
    def _():
        o_ref[...] += b_ref[...]


# --------------------------------------------------------------------------- #
# Helpers
# --------------------------------------------------------------------------- #
def _round_up(x: int, m: int) -> int:
    return ((x + m - 1) // m) * m


def _pick_tile(dim: int, cap: int) -> int:
    """Largest multiple of 128 that divides `dim` and is <= cap.

    Callers guarantee dim % 128 == 0 (padded at init), so this always succeeds
    with at least 128 -- no silent full-dim fallback / VMEM surprise.
    """
    cap = max(128, min(cap, dim))
    cap -= cap % 128
    for t in range(cap, 0, -128):
        if dim % t == 0:
            return t
    return 128


def _vmem_capacity_bytes() -> int:
    try:
        return int(pltpu.get_tpu_info().vmem_capacity_bytes)
    except Exception:
        return 64 * 1024 * 1024  # conservative: v7x per-TensorCore VMEM


# --------------------------------------------------------------------------- #
# One-time parameter fusion (init time -- OUTSIDE the per-call hot path)
# --------------------------------------------------------------------------- #
def fuse_splitter_params(weights, biases, weight_dtype=jnp.bfloat16):
    """Fuse per-model Linear params into one lane-dense slab, once.

    weights: (N, D_in, D_out) -> w_all (D_in_pad, Ntot_pad) in `weight_dtype`
    biases:  (N, 1, D_out)    -> b_all (1, Ntot_pad) f32
    Returns (w_all, b_all, (num_models, d_in, d_out)).
    """
    num_models, d_in, d_out = weights.shape
    n_total = num_models * d_out
    d_in_pad = _round_up(d_in, 128)
    n_total_pad = _round_up(n_total, 128)

    w_all = jnp.transpose(weights, (1, 0, 2)).reshape(d_in, n_total)
    b_all = jnp.reshape(biases, (1, n_total)).astype(jnp.float32)
    if d_in_pad != d_in or n_total_pad != n_total:
        w_all = jnp.pad(w_all, ((0, d_in_pad - d_in), (0, n_total_pad - n_total)))
        b_all = jnp.pad(b_all, ((0, 0), (0, n_total_pad - n_total)))
    w_all = w_all.astype(weight_dtype)
    return (jax.block_until_ready(w_all),
            jax.block_until_ready(b_all),
            (num_models, d_in, d_out))
    # TODO(synk): on v7x, an fp8 weight path (per-tile scale applied in the
    # k==last finalize branch) would halve weight HBM traffic again.


# --------------------------------------------------------------------------- #
# Fused forward (jitted hot path)
# --------------------------------------------------------------------------- #
@jax.jit
def splitter_forward_fused(x, w_all, b_all):
    """x: (B, D_in) -> (B, Ntot_pad) f32 fused output (all models concatenated)."""
    batch, d_in = x.shape
    d_in_pad, n_total_pad = w_all.shape

    # bf16 compute / f32 accumulate; pad K to the fused (padded) width.
    x = x.astype(w_all.dtype)
    if d_in_pad != d_in:
        x = jnp.pad(x, ((0, 0), (0, d_in_pad - d_in)))

    # Batch (M) tiling: one full-B tile while B is small; 256-row tiles (MXU
    # height on v6e/v7x) once B grows large enough to matter.
    if batch > 256:
        tm = 256
        batch_pad = _round_up(batch, tm)
        if batch_pad != batch:
            x = jnp.pad(x, ((0, batch_pad - batch), (0, 0)))
    else:
        tm = batch
        batch_pad = batch
    mt = batch_pad // tm

    # Tile caps (bf16 weights): tk<=2048, tn<=512 -> <=2 MiB per weight buffer,
    # comfortably inside v7x's 64 MiB/TC and v5e's scoped VMEM once raised.
    tn = _pick_tile(n_total_pad, 512)
    # Keep >=2 n tiles so the "parallel" axis can split across v7x's 2 TCs.
    if n_total_pad // tn < 2 and n_total_pad >= 256:
        tn = _pick_tile(n_total_pad, n_total_pad // 2)
    tk = _pick_tile(d_in_pad, 2048)
    nt = n_total_pad // tn
    kt = d_in_pad // tk

    # Weight BlockSpec: 3-deep buffering only when the reduction is deep enough
    # for the weight DMA to be exposed (compute per step is tiny at small B).
    if kt >= 3:
        w_spec = pl.BlockSpec((tk, tn), lambda m, n, k: (k, n),
                              pipeline_mode=pl.Buffered(3))
        n_wbufs = 3
    else:
        w_spec = pl.BlockSpec((tk, tn), lambda m, n, k: (k, n))
        n_wbufs = 2

    w_itemsize = jnp.dtype(w_all.dtype).itemsize
    x_itemsize = jnp.dtype(x.dtype).itemsize
    vmem_need = (n_wbufs * tk * tn * w_itemsize   # buffered weight tiles
                 + 2 * tm * tk * x_itemsize       # double-buffered x tiles
                 + 2 * tm * tn * 4                # f32 output (= accumulator)
                 + 2 * tn * 4)                    # bias tiles
    vmem_limit = int(min(int(0.75 * _vmem_capacity_bytes()),
                         max(32 * 1024 * 1024, 2 * vmem_need)))

    cost = pl.CostEstimate(
        flops=2 * batch_pad * d_in_pad * n_total_pad,
        transcendentals=0,
        bytes_accessed=(batch_pad * d_in_pad * x_itemsize
                        + d_in_pad * n_total_pad * w_itemsize
                        + n_total_pad * 4
                        + batch_pad * n_total_pad * 4),
    )

    y_all = pl.pallas_call(
        fused_splitter_kernel,
        out_shape=jax.ShapeDtypeStruct((batch_pad, n_total_pad), jnp.float32),
        grid_spec=pltpu.PrefetchScalarGridSpec(
            num_scalar_prefetch=0,
            grid=(mt, nt, kt),  # reduction (K) axis last
            in_specs=[
                # Shared input: same rows for every n tile, (M, K)-tiled.
                pl.BlockSpec((tm, tk), lambda m, n, k: (m, k)),
                # Fused weight slab: (K-tile, N-tile).
                w_spec,
                # Fused bias: N-tiled, consumed only on the last K step.
                pl.BlockSpec((1, tn), lambda m, n, k: (0, n)),
            ],
            out_specs=pl.BlockSpec((tm, tn), lambda m, n, k: (m, n)),
        ),
        compiler_params=pltpu.CompilerParams(
            dimension_semantics=("parallel", "parallel", "arbitrary"),
            vmem_limit_bytes=vmem_limit,
        ),
        cost_estimate=cost,
    )(x, w_all, b_all)

    if batch_pad != batch:
        y_all = y_all[:batch]
    return y_all


def splitter_forward(x, fused_params):
    """Mirrors PyTorch Splitter.forward: returns a list of per-model outputs.

    The per-model fan-out is a set of contiguous lane slices of the fused
    output -- no full-output transpose round-trip through HBM.
    """
    w_all, b_all, (num_models, _d_in, d_out) = fused_params
    y_all = splitter_forward_fused(x, w_all, b_all)
    return [y_all[:, i * d_out:(i + 1) * d_out] for i in range(num_models)]


# --------------------------------------------------------------------------- #
# Demo / self-check
# --------------------------------------------------------------------------- #
if __name__ == "__main__":
    # 4 sub-models, batch=8, hidden=128 -> out=128; fused width N*D_OUT = 512.
    NUM_MODELS, B, D_IN, D_OUT = 4, 8, 128, 128

    key = jax.random.PRNGKey(0)
    k_x, k_w, k_b = jax.random.split(key, 3)

    x = jax.random.normal(k_x, (B, D_IN), dtype=jnp.float32)
    weights = jax.random.normal(k_w, (NUM_MODELS, D_IN, D_OUT), dtype=jnp.float32) * 0.1
    biases = jax.random.normal(k_b, (NUM_MODELS, 1, D_OUT), dtype=jnp.float32) * 0.1

    # One-time parameter fusion (init time, outside the per-call jitted path).
    fused = fuse_splitter_params(weights, biases, weight_dtype=jnp.bfloat16)

    outs = splitter_forward(x, fused)
    jax.block_until_ready(outs)

    # Pure-JAX reference per sub-model (same semantics as the PyTorch loop),
    # evaluated at the same bf16-in / f32-accumulate precision as the kernel.
    x_bf = x.astype(jnp.bfloat16)
    refs = [
        jnp.dot(x_bf, weights[i].astype(jnp.bfloat16),
                preferred_element_type=jnp.float32) + biases[i][0]
        for i in range(NUM_MODELS)
    ]

    ok = True
    for got, ref in zip(outs, refs):
        assert got.shape == (B, D_OUT)
        ok &= bool(jnp.allclose(got, ref, atol=2e-2, rtol=2e-2))

    print("KERNEL_OK" if ok else "KERNEL_MISMATCH")
</pallas_src>

<mosaic_0001>
module attributes {stable_mosaic.version = 11 : i64} {
  func.func @fused_splitter_kernel(%arg0: i32, %arg1: i32, %arg2: i32, %arg3: memref<8x128xbf16, #tpu.memory_space<vmem>>, %arg4: memref<128x256xbf16, #tpu.memory_space<vmem>>, %arg5: memref<1x256xf32, #tpu.memory_space<vmem>>, %arg6: memref<8x256xf32, #tpu.memory_space<vmem>>) attributes {dimension_semantics = [#tpu.dimension_semantics<parallel>, #tpu.dimension_semantics<parallel>, #tpu.dimension_semantics<arbitrary>], iteration_bounds = array<i64: 1, 2, 1>, scalar_prefetch = 0 : i64, scratch_operands = 0 : i64, tpu.core_type = #tpu.core_type<tc>, window_params = [{transform_indices = @transform_0, window_bounds = array<i64: 8, 128>}, {transform_indices = @transform_1, window_bounds = array<i64: 128, 256>}, {transform_indices = @transform_2, window_bounds = array<i64: 1, 256>}, {transform_indices = @transform_3, window_bounds = array<i64: 8, 256>}]} {
    %c0 = arith.constant 0 : index
    %c0_0 = arith.constant 0 : index
    %0 = vector.load %arg3[%c0, %c0_0] : memref<8x128xbf16, #tpu.memory_space<vmem>>, vector<8x128xbf16>
    %c0_1 = arith.constant 0 : index
    %c0_2 = arith.constant 0 : index
    %1 = vector.load %arg4[%c0_1, %c0_2] : memref<128x256xbf16, #tpu.memory_space<vmem>>, vector<128x256xbf16>
    %cst = arith.constant dense<0.000000e+00> : vector<8x256xf32>
    %2 = tpu.matmul %0, %1, %cst {dimension_numbers = #tpu.dot_dimension_numbers<[1], [0], [0], [1], [0, 0, 1, 1], [], []>} : vector<8x128xbf16>, vector<128x256xbf16>, vector<8x256xf32> -> vector<8x256xf32>
    %c0_i32 = arith.constant 0 : i32
    %3 = arith.cmpi eq, %arg2, %c0_i32 : i32
    %4 = arith.extui %3 : i1 to i32
    %c0_i32_3 = arith.constant 0 : i32
    %5 = arith.cmpi ne, %4, %c0_i32_3 : i32
    scf.if %5 {
      %c0_8 = arith.constant 0 : index
      %c0_9 = arith.constant 0 : index
      %12 = vector.load %arg6[%c0_8, %c0_9] : memref<8x256xf32, #tpu.memory_space<vmem>>, vector<8x256xf32>
      tpu.vector_store %arg6[%c0_8, %c0_9], %2 {strides = array<i32>} : memref<8x256xf32, #tpu.memory_space<vmem>>, vector<8x256xf32>,
    } else {
    }
    %c0_i32_4 = arith.constant 0 : i32
    %6 = arith.cmpi sgt, %arg2, %c0_i32_4 : i32
    %7 = arith.extui %6 : i1 to i32
    %c0_i32_5 = arith.constant 0 : i32
    %8 = arith.cmpi ne, %7, %c0_i32_5 : i32
    scf.if %8 {
      %c0_8 = arith.constant 0 : index
      %c0_9 = arith.constant 0 : index
      %12 = vector.load %arg6[%c0_8, %c0_9] : memref<8x256xf32, #tpu.memory_space<vmem>>, vector<8x256xf32>
      %13 = arith.addf %12, %2 : vector<8x256xf32>
      %c0_10 = arith.constant 0 : index
      %c0_11 = arith.constant 0 : index
      %14 = vector.load %arg6[%c0_10, %c0_11] : memref<8x256xf32, #tpu.memory_space<vmem>>, vector<8x256xf32>
      tpu.vector_store %arg6[%c0_10, %c0_11], %13 {strides = array<i32>} : memref<8x256xf32, #tpu.memory_space<vmem>>, vector<8x256xf32>,
    } else {
    }
    %c0_i32_6 = arith.constant 0 : i32
    %9 = arith.cmpi eq, %arg2, %c0_i32_6 : i32
    %10 = arith.extui %9 : i1 to i32
    %c0_i32_7 = arith.constant 0 : i32
    %11 = arith.cmpi ne, %10, %c0_i32_7 : i32
    scf.if %11 {
      %c0_8 = arith.constant 0 : index
      %c0_9 = arith.constant 0 : index
      %12 = vector.load %arg6[%c0_8, %c0_9] : memref<8x256xf32, #tpu.memory_space<vmem>>, vector<8x256xf32>
      %c0_10 = arith.constant 0 : index
      %c0_11 = arith.constant 0 : index
      %13 = vector.load %arg5[%c0_10, %c0_11] : memref<1x256xf32, #tpu.memory_space<vmem>>, vector<1x256xf32>
      %14 = vector.broadcast %13 : vector<1x256xf32> to vector<8x256xf32>
      %15 = arith.addf %12, %14 : vector<8x256xf32>
      %c0_12 = arith.constant 0 : index
      %c0_13 = arith.constant 0 : index
      %16 = vector.load %arg6[%c0_12, %c0_13] : memref<8x256xf32, #tpu.memory_space<vmem>>, vector<8x256xf32>
      tpu.vector_store %arg6[%c0_12, %c0_13], %15 {strides = array<i32>} : memref<8x256xf32, #tpu.memory_space<vmem>>, vector<8x256xf32>,
    } else {
    }
    return
  }
  func.func @transform_0(%arg0: i32, %arg1: i32, %arg2: i32) -> (i32, i32) {
    %c0_i32 = arith.constant 0 : i32
    return %arg0, %arg2 : i32, i32
  }
  func.func @transform_1(%arg0: i32, %arg1: i32, %arg2: i32) -> (i32, i32) {
    %c0_i32 = arith.constant 0 : i32
    return %arg2, %arg1 : i32, i32
  }
  func.func @transform_2(%arg0: i32, %arg1: i32, %arg2: i32) -> (i32, i32) {
    %c0_i32 = arith.constant 0 : i32
    %c0_i32_0 = arith.constant 0 : i32
    return %c0_i32, %arg1 : i32, i32
  }
  func.func @transform_3(%arg0: i32, %arg1: i32, %arg2: i32) -> (i32, i32) {
    %c0_i32 = arith.constant 0 : i32
    return %arg0, %arg1 : i32, i32
  }
}

</mosaic_0001>

<bundles_post_ra>
// kernel: splitter_forward_fused.1
= control target key start
LH: loop header
LB: loop body
LE: loop exit
PB: predicated region body
PF: predicated region fallthrough
CT: control target
= control target key end

     0   :  { %8 = vsyncpa [#allocation3], 0  ;;  %s1017_s0 = inlined_call_operand.vmem [shape: bf16[8,128], index: 0, kind: input, shape index: {}]   ;;  %s1018_s1 = inlined_call_operand.hbm [shape: bf16[128,512], index: 1, kind: input, shape index: {}]   ;;  %s1019_s2 = inlined_call_operand.vmem [shape: f32[1,512], index: 2, kind: input, shape index: {}]   ;;  %s1020_s3 = inlined_call_operand.hbm [shape: f32[8,512], index: 3, kind: output, shape index: {}]  }
   0x1   :  { %10 = vsyncpa [#allocation3 + $0x1], 0 }
   0x2   :  { %11 = vsyncpa [#allocation4], 0 }
   0x3   :  { %13 = vsyncpa [#allocation4 + $0x1], 0  ;;  %s855_s12 = smov 0   ;;  %s857_s13 = smov 0  }
   0x4   :  { %s859_s14 = smov 0   ;;  %s861_s15 = smov 0  }
   0x5   :  { %s863_s16 = smov 0   ;;  %s865_s17 = smov 0  }
   0x6 LB: > { %s554_s18 = sadd.s32 4294967295, %s830_s17   ;;  %s555_s19 = sadd.s32 4294967294, %s830_s17   ;;  %s830_s17 = sphi %s865_s17, %s19_s17   ;;  %s826_s16 = sphi %s863_s16, %s1029_s16   ;;  %s822_s15 = sphi %s861_s15, %s1028_s15   ;;  %s818_s14 = sphi %s859_s14, %s1027_s14   ;;  %s814_s13 = sphi %s857_s13, %s1026_s13   ;;  %s810_s12 = sphi %s855_s12, %s1025_s12  }
   0x7   : > { %s34_s20 = sadd.s32 1, %s826_s16  ;;  %s75_s21 = sadd.s32 1, %s818_s14 }
   0x8   : > { %p36_p0 = scmp.ge.s32.totalorder %s34_s20, 2  ;;  %p82_p1 = scmp.ne.s32.totalorder %s818_s14, %s814_s13 }
   0x9   : > { %p83_p2 = scmp.eq.s32.totalorder %s830_s17, 0  ;;  %p88_p3 = scmp.ne.s32.totalorder %s814_s13, %s810_s12 }
   0xa   : > { %s1031_s20 = smov (%p36_p0, %s34_s20), 0  ;;  %p89_p5 = scmp.eq.s32.totalorder %s554_s18, 0 }
   0xb   : > { %p896_p4 = por %p83_p2, %p82_p1  ;;  %s71_s23 = ssub.s32 %s826_s16, %s1031_s20 }
   0xc   : > { %p140_p6 = scmp.eq.s32.totalorder %s554_s18, 1  ;;  %p73_p7 = scmp.eq.s32.totalorder %s71_s23, 0 }
   0xd   : > { %p902_p8 = por %p89_p5, %p88_p3  ;;  %p146_p10 = scmp.eq.s32.totalorder %s555_s19, 1 }
   0xe   : > { %p906_p9 = por %p140_p6, %p82_p1  ;;  %p558_p12 = scmp.ge.s32.totalorder %s830_s17, 2 }
   0xf   : > { %s911_s26 = scalar_select %p73_p7, %s818_s14, %s75_s21  }
  0x10   : > { %p913_p11 = por %p146_p10, %p88_p3  ;;  %p665_p13 = scmp.lt.s32.totalorder %s830_s17, 2 }
  0x11   : > { %s176_s28 = sand.u32 1, %s818_s14   ;;  %s635_s30 = sshll.u32 %s826_s16, 3 }
  0x12   : > { %s559_s29 = sshll.u32 %s176_s28, 7  ;;  %s188_s6 = scalar_lea.hbm %s1018_s1, %s635_s30 }
  0x13   : > { %s180_s7 = scalar_lea.vmem [#allocation2], %s559_s29  ;;  %s189_s9 = sshll.u32 %s188_s6, 4  ;;  %s190_s9 = int_to_ptr.hbm [resolvable:$true] %s189_s9 }
  0x14   : > { %s191_s8 = sshll.u32 %s180_s7, 4  ;;  %p658_p0 = pnand %p665_p13, %p896_p4  ;;  %s192_s8 = int_to_ptr.vmem [resolvable:$true] %s191_s8 }
  0x15   : > { %s177_s10 = scalar_lea.sflag [#allocation3], %s176_s28  ;;  %s832_s11 = smov 256  }
  0x16   : > { %s833_s18 = smov 128   ;;  %s834_s19 = smov 8  }
  0x17   : > { %660 = dma.hbm_to_vmem [thread:$0]  (!%p658_p0), %s190_s9, 2048, %s192_s8, %s177_s10, %s832_s11, %s833_s18, %s834_s19  }
  0x18   : > { %p562_p1 = scmp.ge.s32.totalorder %s830_s17, 1  ;;  %p207_p2 = scmp.lt.s32.totalorder %s830_s17, 3 }
  0x1a   : > { %p208_p3 = pnand %p562_p1, %p207_p2 }
  0x1b   : > { %s929_s21 = sand.u32 (!%p208_p3), 1, %s814_s13  }
  0x1c   : > { %211 = sbr.rel (%p208_p3) target bundleno = 203 (0xcb), region = 32  ;;  %s563_s23 = sshll.u32 (!%p208_p3), %s929_s21, 7 }
  0x1d   : > { %s214_s29 = scalar_lea.sflag (!%p208_p3), [#allocation3], %s929_s21  ;;  %s933_s30 = scalar_lea.vmem (!%p208_p3), [#allocation2], %s563_s23 }
  0x21   : > { %801 = dma.done.wait (%p902_p8), %s214_s29, 2048  }
  0x22   : > { %803 = vsyncadd (%p902_p8), %s214_s29, 4294965248  ;;  %v624_v0 = vld [vmem:[%s933_s30 + $0x70] sm:$0xf]  ;;  %v651_v1 = vld [vmem:[%s933_s30 + $0x74] sm:$0xf0]  ;;  %s565_s28 = sshll.u32 %s822_s15, 1 }
  0x23   : > { %v650_v2 = vld [vmem:[%s933_s30 + $0x74] sm:$0xf]  ;;  %v625_v3 = vor.u32 %v651_v1, %v624_v0  ;;  %v626_v4 = vld [vmem:[%s933_s30 + $0x78] sm:$0xf0]  ;;  %v616_v5 = vld [vmem:[%s933_s30 + $0x60] sm:$0xf] }
  0x24   : > { %v649_v6 = vld [vmem:[%s933_s30 + $0x64] sm:$0xf0]  ;;  %v629_v7 = vor.u32 %v650_v2, %v626_v4  ;;  %v648_v8 = vld [vmem:[%s933_s30 + $0x64] sm:$0xf]  ;;  %v618_v9 = vld [vmem:[%s933_s30 + $0x68] sm:$0xf0] }
  0x25   : > { %364 = vmatpush.bf16.msra.mxu0 %v625_v3  ;;  %v617_v10 = vor.u32 %v649_v6, %v616_v5  ;;  %v621_v11 = vor.u32 %v648_v8, %v618_v9  ;;  %v608_v12 = vld [vmem:[%s933_s30 + $0x50] sm:$0xf]  ;;  %v647_v13 = vld [vmem:[%s933_s30 + $0x54] sm:$0xf0]  ;;  %v646_v14 = vld [vmem:[%s933_s30 + $0x54] sm:$0xf] }
  0x26   : > { %377 = vmatpush.bf16.msra.mxu1 %v629_v7  ;;  %v610_v15 = vld [vmem:[%s933_s30 + $0x58] sm:$0xf0]  ;;  %v609_v16 = vor.u32 %v647_v13, %v608_v12  ;;  %v600_v18 = vld [vmem:[%s933_s30 + $0x40] sm:$0xf]  ;;  %v645_v19 = vld [vmem:[%s933_s30 + $0x44] sm:$0xf0] }
  0x27   : > { %v613_v17 = vor.u32 %v646_v14, %v610_v15  ;;  %v644_v20 = vld [vmem:[%s933_s30 + $0x44] sm:$0xf]  ;;  %v602_v21 = vld [vmem:[%s933_s30 + $0x48] sm:$0xf0]  ;;  %v601_v22 = vor.u32 %v645_v19, %v600_v18  ;;  %v592_v24 = vld [vmem:[%s933_s30 + $0x30] sm:$0xf] }
  0x28   : > { %v605_v23 = vor.u32 %v644_v20, %v602_v21  ;;  %v643_v25 = vld [vmem:[%s933_s30 + $0x34] sm:$0xf0]  ;;  %v642_v26 = vld [vmem:[%s933_s30 + $0x34] sm:$0xf]  ;;  %v594_v27 = vld [vmem:[%s933_s30 + $0x38] sm:$0xf0] }
  0x29   : > { %365 = vmatpush.bf16.msra.mxu0 %v617_v10  ;;  %v593_v28 = vor.u32 %v643_v25, %v592_v24  ;;  %v597_v29 = vor.u32 %v642_v26, %v594_v27  ;;  %v584_v30 = vld [vmem:[%s933_s30 + $0x20] sm:$0xf]  ;;  %v641_v31 = vld [vmem:[%s933_s30 + $0x24] sm:$0xf0]  ;;  %v640_v32 = vld [vmem:[%s933_s30 + $0x24] sm:$0xf] }
  0x2a   : > { %378 = vmatpush.bf16.msra.mxu1 %v621_v11  ;;  %v586_v33 = vld [vmem:[%s933_s30 + $0x28] sm:$0xf0]  ;;  %v585_v34 = vor.u32 %v641_v31, %v584_v30  ;;  %v576_v36 = vld [vmem:[%s933_s30 + $0x10] sm:$0xf]  ;;  %v639_v37 = vld [vmem:[%s933_s30 + $0x14] sm:$0xf0] }
  0x2b   : > { %v589_v35 = vor.u32 %v640_v32, %v586_v33  ;;  %v638_v38 = vld [vmem:[%s933_s30 + $0x14] sm:$0xf]  ;;  %v578_v39 = vld [vmem:[%s933_s30 + $0x18] sm:$0xf0]  ;;  %v577_v40 = vor.u32 %v639_v37, %v576_v36  ;;  %v568_v42 = vld [vmem:[%s933_s30] sm:$0xf] }
  0x2c   : > { %v581_v41 = vor.u32 %v638_v38, %v578_v39  ;;  %v637_v43 = vld [vmem:[%s933_s30 + $0x4] sm:$0xf0]  ;;  %v636_v44 = vld [vmem:[%s933_s30 + $0x4] sm:$0xf]  ;;  %v570_v45 = vld [vmem:[%s933_s30 + $0x8] sm:$0xf0] }
  0x2d   : > { %366 = vmatpush.bf16.msra.mxu0 %v609_v16  ;;  %v569_v46 = vor.u32 %v637_v43, %v568_v42  ;;  %v573_v47 = vor.u32 %v636_v44, %v570_v45  ;;  %v267_v48 = vld [vmem:[%s1017_s0] sm:$0xf]  ;;  %p262_p4 = scmp.lt.s32.totalorder %s565_s28, 3  ;;  %s652_s7 = sshll.u32 %s822_s15, 4 }
  0x2e   : > { %379 = vmatpush.bf16.msra.mxu1 %v613_v17  ;;  %s564_s8 = sshll.u32 %s929_s21, 4  ;;  %s435_s11 = scalar_lea.hbm %s1020_s3, %s652_s7 }
  0x2f   : > { %s1033_s28 = smov (!%p262_p4, %s565_s28), 3  ;;  %s251_s18 = scalar_lea.vmem [#allocation5], %s564_s8 }
  0x30   : > { %s264_s6 = scalar_lea.vmem %s1019_s2, %s1033_s28  ;;  %s437_s19 = sshll.u32 %s251_s18, 4  ;;  %s438_s19 = int_to_ptr.vmem [resolvable:$true] %s437_s19 }
  0x31   : > { %367 = vmatpush.bf16.msra.mxu0 %v601_v22  ;;  %v411_v49 = vld [vmem:[%s264_s6] sm:$0x3]  ;;  %s439_s23 = sshll.u32 %s435_s11, 4  ;;  %s422_s15 = scalar_lea.sflag [#allocation4], %s929_s21  ;;  %s440_s23 = int_to_ptr.hbm [resolvable:$true] %s439_s23 }
  0x32   : > { %380 = vmatpush.bf16.msra.mxu1 %v605_v23  ;;  %v413_v50 = vperm.slane %v411_v49, 0  ;;  %v414_v51 = vperm.slane %v411_v49, 1  ;;  %s762_s29 = sshra.s32 %s440_s23, 4  ;;  %s768_s28 = scalar_lea.hbm %s1020_s3, 32  ;;  %s763_s29 = int_to_ptr.hbm [resolvable:$true] %s762_s29 }
  0x33   : > { %s764_s30 = scalar_lea.hbm %s763_s29, 16  ;;  %p769_p8 = scmp.lt.s32.totalorder %s763_s29, %s1020_s3 }
  0x34   : > { %p765_p5 = scmp.ne.s32.totalorder %s763_s29, %s764_s30  ;;  %p770_p10 = scmp.lt.s32.totalorder %s768_s28, %s764_s30 }
  0x35   : > { %368 = vmatpush.bf16.msra.mxu0 %v593_v28 }
  0x36   : > { %381 = vmatpush.bf16.msra.mxu1 %v597_v29  ;;  %p766_p6 = pnand %p765_p5, %p906_p9  ;;  %p771_p13 = por %p770_p10, %p769_p8 }
  0x38   : > { %p767_p7 = pneg %p766_p6 }
  0x39   : > { %369 = vmatpush.bf16.msra.mxu0 %v585_v34 }
  0x3a   : > { %382 = vmatpush.bf16.msra.mxu1 %v589_v35  ;;  %p772_p0 = pnand %p771_p13, %p767_p7 }
  0x3d   : > { %370 = vmatpush.bf16.msra.mxu0 %v577_v40 }
  0x3e   : > { %383 = vmatpush.bf16.msra.mxu1 %v581_v41 }
  0x41   : > { %371 = vmatpush.bf16.msra.mxu0 %v569_v46 }
  0x42   : > { %384 = vmatpush.bf16.msra.mxu1 %v573_v47 }
  0x44   : > { %372 = vmatmul.bf16.vlgmr.msra.gmra.mxu0 %v267_v48 }
  0x45   : > { %385 = vmatmul.bf16.vlgmr.msra.gmra.mxu1 %v267_v48 }
  0xc1   : > { %v373_v52 = vpop.f32.mrf.mxu0 }
  0xc2   : > { %v417_v53 = vadd.f32 %v413_v50, %v373_v52  ;;  %v386_v54 = vpop.f32.mrf.mxu1 }
  0xc3   : > { %v418_v55 = vadd.f32 %v414_v51, %v386_v54 }
  0xc4   : > { %419 = vst [vmem:[%s251_s18] sm:$0xff] %v417_v53 }
  0xc5   : > { %420 = vst [vmem:[%s251_s18 + $0x8] sm:$0xff] %v418_v55 }
  0xc6   : > { %775 = shalt.err (!%p772_p0)
}
  0xc7   : > { %655 = dma.vmem_to_hbm [thread:$0]  (%p906_p9), %s438_s19, 256, %s440_s23, %s422_s15  }
  0xc9   : > { %v375_v56 = vpop.f32.mrf.mxu0 }
  0xca   : > { %v388_v57 = vpop.f32.mrf.mxu1 }
  0xcb PF: > { %s451_s21 = sand.u32 1, %s810_s12   ;;  %p662_p1 = pnand %p558_p12, %p913_p11 }
  0xcc   : > { %s452_s6 = scalar_lea.sflag [#allocation4], %s451_s21 }
  0xcd   : > { %p663_p2 = pneg %p662_p1 }
  0xcf   : > { %805 = dma.done.wait (%p663_p2), %s452_s6, 256  }
  0xd0   : > { %807 = vsyncadd (%p663_p2), %s452_s6, 4294967040  ;;  %s19_s17 = sadd.s32 1, %s830_s17   ;;  %s1025_s12 = smov %s814_s13 }
  0xd1   : > { %p16_p3 = scmp.ge.s32.totalorder %s19_s17, 4   ;;  %s1026_s13 = smov %s818_s14 }
  0xd2   : > { %s1027_s14 = smov %s911_s26  ;;  %s1028_s15 = smov %s826_s16 }
  0xd3   : > { %s1029_s16 = smov %s1031_s20  ;;  %18 = sbr.rel (!%p16_p3) target bundleno = 6 (0x6), region = 95 }
  0xd8   :  { %458 = vsyncpa [#allocation3], 1 }
  0xd9   :  { %460 = vsyncpa [#allocation3 + $0x1], 1 }
  0xda   :  { %461 = vsyncpa [#allocation4], 1 }
  0xdb   :  { %463 = vsyncpa [#allocation4 + $0x1], 1 }

</bundles_post_ra>
